<compile_context>
chip_gen: v7x
topology: tpu7x:2x2x1
jax: 0.10.0
libtpu: 0.0.40
codegen_flags: <defaults>
</compile_context>

<pallas_src>
import functools
import math

import jax
import jax.numpy as jnp
from jax.experimental import pallas as pl
from jax.experimental.pallas import tpu as pltpu


_LANE = 128
_VMEM_LIMIT = 32 * 1024 * 1024  # fits v5e/v6e scoped VMEM and v7x's 64 MiB physical


def _round_up(x, m):
    return (x + m - 1) // m * m


def _pick_tm():
    # Row-tile for the im2col matmuls: 512 on v6e/v7x, 256 on v5e (smaller
    # scoped-VMEM default, lower HBM bandwidth).
    try:
        kind = jax.devices()[0].device_kind.lower()
        if 'v5 lite' in kind or 'v5e' in kind or 'v5litepod' in kind:
            return 256
    except Exception:
        pass
    return 512


_TM_MAX = _pick_tm()


# ---------------------------------------------------------------------------
# Pallas kernels
# ---------------------------------------------------------------------------

def _conv_matmul_kernel(p_ref, w_ref, scale_ref, shift_ref, *rest,
                        act, slope, has_residual):
    """Fused (TM,K)@(K,Cp) matmul + folded-BN affine + activation (+ residual)."""
    if has_residual:
        res_ref, o_ref = rest
    else:
        (o_ref,) = rest
    acc = jnp.dot(p_ref[...], w_ref[...], preferred_element_type=jnp.float32)
    y = acc * scale_ref[...] + shift_ref[...]
    if act == 'leaky':
        y = jnp.maximum(y, y * slope)        # leaky relu, one VALU op
    elif act == 'relu':
        y = jnp.maximum(y, 0.0)
    if has_residual:
        y = y + res_ref[...]                 # FPN top-down add fused here
    o_ref[...] = y.astype(o_ref.dtype)


def _head_matmul_kernel(p_ref, w_ref, bias_ref, mask_ref, o_ref):
    """Fused bbox/class/landmark heads: matmul + bias + lane-masked sigmoid.

    softmax over the 2 classes of an anchor == sigmoid(logit0 - logit1); that
    logit difference was folded into the class weight columns, so those columns
    just get a sigmoid (selected by `mask`); everything else is identity.
    """
    acc = jnp.dot(p_ref[...], w_ref[...], preferred_element_type=jnp.float32)
    y = acc + bias_ref[...]
    sig = 1.0 / (1.0 + jnp.exp(-y))
    o_ref[...] = jnp.where(mask_ref[...] != 0.0, sig, y).astype(o_ref.dtype)


def _depthwise_kernel(*refs, taps, nph, act, slope):
    """3x3 depthwise conv for one image: 9 shifted taps of the padded activation
    (polyphase-decomposed for stride 2), fused BN affine + activation."""
    phase_refs = refs[:nph]
    w_ref, scale_ref, shift_ref, o_ref = refs[nph:]
    _, ho, wo, c = o_ref.shape
    wv = w_ref[...].astype(jnp.float32)                       # (9, C)
    acc = None
    for k, (pi, io, jo) in enumerate(taps):
        v = phase_refs[pi][:, io:io + ho, jo:jo + wo, :].astype(jnp.float32)
        term = v * wv[k:k + 1, :].reshape(1, 1, 1, c)
        acc = term if acc is None else acc + term
    y = (acc * scale_ref[...].reshape(1, 1, 1, c)
         + shift_ref[...].reshape(1, 1, 1, c))
    if act == 'leaky':
        y = jnp.maximum(y, y * slope)
    elif act == 'relu':
        y = jnp.maximum(y, 0.0)
    o_ref[...] = y.astype(o_ref.dtype)


# ---------------------------------------------------------------------------
# Layer wrappers: im2col glue + pallas_call with M-tiled grids
# ---------------------------------------------------------------------------

def _im2col(x, kh, kw, stride, pad):
    n, h, w, c = x.shape
    xp = jnp.pad(x, ((0, 0), (pad, pad), (pad, pad), (0, 0)))
    ho = (h + 2 * pad - kh) // stride + 1
    wo = (w + 2 * pad - kw) // stride + 1
    cols = []
    for i in range(kh):
        for j in range(kw):
            cols.append(jax.lax.slice(
                xp, (0, i, j, 0),
                (n, i + (ho - 1) * stride + 1, j + (wo - 1) * stride + 1, c),
                (1, stride, stride, 1)))
    p = jnp.concatenate(cols, axis=-1)                        # (N, Ho, Wo, KH*KW*C)
    return p.reshape(n * ho * wo, kh * kw * c), (n, ho, wo)


@functools.partial(jax.jit, static_argnames=('stride', 'pad', 'act', 'slope'))
def _conv2d_bn_act(x, w, scale, shift, residual=None, *, stride, pad, act, slope):
    """Regular conv (NHWC) as an M-tiled, bf16, lane-dense Pallas matmul."""
    kh, kw, cin, cout = w.shape
    if kh == 1 and kw == 1 and stride == 1 and pad == 0:
        n, ho, wo, _ = x.shape
        p = x.reshape(n * ho * wo, cin)                       # 1x1 conv: no im2col
    else:
        p, (n, ho, wo) = _im2col(x, kh, kw, stride, pad)
    m, k = p.shape
    cp = _round_up(cout, _LANE)                               # lane-dense output
    tm = min(_TM_MAX, _round_up(m, 8))
    m_pad = _round_up(m, tm)

    p_b = jnp.pad(p, ((0, m_pad - m), (0, 0))).astype(jnp.bfloat16)
    w_b = jnp.pad(w.reshape(kh * kw * cin, cout),
                  ((0, 0), (0, cp - cout))).astype(jnp.bfloat16)
    scale_p = jnp.pad(scale, (0, cp - cout), constant_values=1.0).reshape(1, cp)
    shift_p = jnp.pad(shift, (0, cp - cout)).reshape(1, cp)

    has_residual = residual is not None
    args = [p_b, w_b, scale_p, shift_p]
    in_specs = [
        pl.BlockSpec((tm, k), lambda i: (i, 0)),
        pl.BlockSpec((k, cp), lambda i: (0, 0)),
        pl.BlockSpec((1, cp), lambda i: (0, 0)),
        pl.BlockSpec((1, cp), lambda i: (0, 0)),
    ]
    if has_residual:
        r = jnp.pad(residual.reshape(m, cout).astype(jnp.float32),
                    ((0, m_pad - m), (0, cp - cout)))
        args.append(r)
        in_specs.append(pl.BlockSpec((tm, cp), lambda i: (i, 0)))

    y = pl.pallas_call(
        functools.partial(_conv_matmul_kernel, act=act, slope=slope,
                          has_residual=has_residual),
        grid=(m_pad // tm,),
        in_specs=in_specs,
        out_specs=pl.BlockSpec((tm, cp), lambda i: (i, 0)),
        out_shape=jax.ShapeDtypeStruct((m_pad, cp), jnp.float32),
        compiler_params=pltpu.CompilerParams(
            dimension_semantics=("parallel",),
            vmem_limit_bytes=_VMEM_LIMIT),
    )(*args)
    return y[:m, :cout].reshape(n, ho, wo, cout)


@functools.partial(jax.jit, static_argnames=('stride', 'act', 'slope'))
def _depthwise3x3_bn_act(x, w, scale, shift, *, stride, act, slope):
    """3x3 depthwise conv (pad=1) without im2col duplication (1x HBM traffic)."""
    n, h, wd, c = x.shape
    ho = (h + 2 - 3) // stride + 1
    wo = (wd + 2 - 3) // stride + 1
    xp = jnp.pad(x, ((0, 0), (1, 1), (1, 1), (0, 0))).astype(jnp.bfloat16)
    if stride == 1:
        phases = [xp]
        taps = tuple((0, i, j) for i in range(3) for j in range(3))
    else:  # stride == 2: polyphase split (a partition of xp, not a duplication)
        phases = [xp[:, a::2, b::2, :] for a in range(2) for b in range(2)]
        taps = tuple(((i % 2) * 2 + (j % 2), i // 2, j // 2)
                     for i in range(3) for j in range(3))
    nph = len(phases)

    in_specs = []
    for ph in phases:
        _, hp, wp, _ = ph.shape
        in_specs.append(pl.BlockSpec((1, hp, wp, c), lambda b: (b, 0, 0, 0)))
    in_specs += [
        pl.BlockSpec((9, c), lambda b: (0, 0)),
        pl.BlockSpec((1, c), lambda b: (0, 0)),
        pl.BlockSpec((1, c), lambda b: (0, 0)),
    ]
    return pl.pallas_call(
        functools.partial(_depthwise_kernel, taps=taps, nph=nph,
                          act=act, slope=slope),
        grid=(n,),
        in_specs=in_specs,
        out_specs=pl.BlockSpec((1, ho, wo, c), lambda b: (b, 0, 0, 0)),
        out_shape=jax.ShapeDtypeStruct((n, ho, wo, c), jnp.float32),
        compiler_params=pltpu.CompilerParams(
            dimension_semantics=("parallel",),
            vmem_limit_bytes=_VMEM_LIMIT),
    )(*phases, w.reshape(9, c), scale.reshape(1, c), shift.reshape(1, c))


@jax.jit
def _fused_head_forward(x, w_p, bias_p, mask_p):
    """One matmul per SSH level for all three heads + in-kernel 2-way softmax."""
    n, h, wd, c = x.shape
    m = n * h * wd
    cp = w_p.shape[1]
    tm = min(_TM_MAX, _round_up(m, 8))
    m_pad = _round_up(m, tm)
    p_b = jnp.pad(x.reshape(m, c), ((0, m_pad - m), (0, 0))).astype(jnp.bfloat16)
    y = pl.pallas_call(
        _head_matmul_kernel,
        grid=(m_pad // tm,),
        in_specs=[
            pl.BlockSpec((tm, c), lambda i: (i, 0)),
            pl.BlockSpec((c, cp), lambda i: (0, 0)),
            pl.BlockSpec((1, cp), lambda i: (0, 0)),
            pl.BlockSpec((1, cp), lambda i: (0, 0)),
        ],
        out_specs=pl.BlockSpec((tm, cp), lambda i: (i, 0)),
        out_shape=jax.ShapeDtypeStruct((m_pad, cp), jnp.float32),
        compiler_params=pltpu.CompilerParams(
            dimension_semantics=("parallel",),
            vmem_limit_bytes=_VMEM_LIMIT),
    )(p_b, w_p.astype(jnp.bfloat16), bias_p, mask_p)
    return y[:m].reshape(n, h, wd, cp)


def _apply_layer(x, layer, residual=None):
    if layer['type'] == 'conv':
        return _conv2d_bn_act(x, layer['w'], layer['scale'], layer['shift'],
                              residual,
                              stride=layer['stride'], pad=layer['pad'],
                              act=layer['act'], slope=layer['slope'])
    return _depthwise3x3_bn_act(x, layer['w'], layer['scale'], layer['shift'],
                                stride=layer['stride'],
                                act=layer['act'], slope=layer['slope'])


def _nearest_resize(x, ho, wo):
    # Matches F.interpolate(mode='nearest'): src = floor(dst * in / out)
    n, h, w, c = x.shape
    hi = (jnp.arange(ho) * h) // ho
    wi = (jnp.arange(wo) * w) // wo
    return x[:, hi][:, :, wi]


# ---------------------------------------------------------------------------
# Deterministic parameter construction (shapes follow the PyTorch module)
# ---------------------------------------------------------------------------

class _KeyGen:
    def __init__(self, seed):
        self._key = jax.random.PRNGKey(seed)

    def __call__(self):
        self._key, sub = jax.random.split(self._key)
        return sub


def _bn_affine(kg, c):
    gamma = 1.0 + 0.1 * jax.random.normal(kg(), (c,), jnp.float32)
    beta = 0.1 * jax.random.normal(kg(), (c,), jnp.float32)
    mean = 0.1 * jax.random.normal(kg(), (c,), jnp.float32)
    var = jax.random.uniform(kg(), (c,), jnp.float32, minval=0.5, maxval=1.5)
    scale = gamma / jnp.sqrt(var + 1e-5)    # exact eval-mode BatchNorm folding
    shift = beta - mean * scale
    return scale, shift


def _conv_bn(kg, cin, cout, k, stride, pad, act, slope):
    w = jax.random.normal(kg(), (k, k, cin, cout), jnp.float32) / math.sqrt(k * k * cin)
    scale, shift = _bn_affine(kg, cout)
    return dict(type='conv', w=w, scale=scale, shift=shift,
                stride=stride, pad=pad, act=act, slope=slope)


def _dw_bn(kg, c, stride, act, slope):
    w = jax.random.normal(kg(), (3, 3, c), jnp.float32) / 3.0
    scale, shift = _bn_affine(kg, c)
    return dict(type='dw', w=w, scale=scale, shift=shift,
                stride=stride, act=act, slope=slope)


def _conv_dw(kg, cin, cout, stride, slope=0.1):
    return [_dw_bn(kg, cin, stride, 'leaky', slope),
            _conv_bn(kg, cin, cout, 1, 1, 0, 'leaky', slope)]


def _head_conv(kg, cin, cout):
    # 1x1 conv with bias (prediction heads), stored as (cin, cout) matmul weights
    w = jax.random.normal(kg(), (cin, cout), jnp.float32) / math.sqrt(cin)
    b = 0.1 * jax.random.normal(kg(), (cout,), jnp.float32)
    return w, b


def _build_fused_heads(class_head, bbox_head, ldm_head):
    """Per FPN level: fuse the three 1x1 heads into one matmul (Cout=32 -> 128 lanes)
    and fold the 2-way softmax into the class columns (softmax([a,b])[0] ==
    sigmoid(a-b), and the logit difference is itself a linear map)."""
    heads = []
    for (wc, bc), (wb, bb), (wl, bl) in zip(class_head, bbox_head, ldm_head):
        nc = wc.shape[1]
        swap = jnp.arange(nc) ^ 1                    # pairwise class0<->class1 swap
        wc_d = wc - wc[:, swap]
        bc_d = bc - bc[swap]
        w = jnp.concatenate([wb, wc_d, wl], axis=1)  # (64, 8+4+20=32)
        b = jnp.concatenate([bb, bc_d, bl])
        mask = jnp.concatenate([jnp.zeros_like(bb), jnp.ones_like(bc_d),
                                jnp.zeros_like(bl)])
        ncols = w.shape[1]
        cp = _round_up(ncols, _LANE)
        heads.append(dict(
            w=jnp.pad(w, ((0, 0), (0, cp - ncols))),
            bias=jnp.pad(b, (0, cp - ncols)).reshape(1, cp),
            mask=jnp.pad(mask, (0, cp - ncols)).reshape(1, cp)))
    return heads


def init_retinaface_params(seed=0):
    # cfg_mnet: in_channel=32, out_channel=64, return_layers stage1/2/3, 2 anchors
    kg = _KeyGen(seed)
    body = dict(
        stage1=[_conv_bn(kg, 3, 8, 3, 2, 1, 'leaky', 0.1)]
               + _conv_dw(kg, 8, 16, 1) + _conv_dw(kg, 16, 32, 2)
               + _conv_dw(kg, 32, 32, 1) + _conv_dw(kg, 32, 64, 2)
               + _conv_dw(kg, 64, 64, 1),
        stage2=_conv_dw(kg, 64, 128, 2) + _conv_dw(kg, 128, 128, 1)
               + _conv_dw(kg, 128, 128, 1) + _conv_dw(kg, 128, 128, 1)
               + _conv_dw(kg, 128, 128, 1) + _conv_dw(kg, 128, 128, 1),
        stage3=_conv_dw(kg, 128, 256, 2) + _conv_dw(kg, 256, 256, 1),
    )
    inc, outc = 32, 64
    in_list = [inc * 2, inc * 4, inc * 8]            # [64, 128, 256]
    leaky = 0.1 if outc <= 64 else 0.0
    fpn = dict(
        output1=_conv_bn(kg, in_list[0], outc, 1, 1, 0, 'leaky', leaky),
        output2=_conv_bn(kg, in_list[1], outc, 1, 1, 0, 'leaky', leaky),
        output3=_conv_bn(kg, in_list[2], outc, 1, 1, 0, 'leaky', leaky),
        merge1=_conv_bn(kg, outc, outc, 3, 1, 1, 'leaky', leaky),
        merge2=_conv_bn(kg, outc, outc, 3, 1, 1, 'leaky', leaky),
    )

    def make_ssh(inc_, outc_):
        l = 0.1 if outc_ <= 64 else 0.0
        # conv_bn_no_relu branches feed the post-concat ReLU directly, so the ReLU
        # is folded into those branch epilogues (elementwise => identical result).
        return dict(
            conv3X3=_conv_bn(kg, inc_, outc_ // 2, 3, 1, 1, 'relu', 0.0),
            conv5X5_1=_conv_bn(kg, inc_, outc_ // 4, 3, 1, 1, 'leaky', l),
            conv5X5_2=_conv_bn(kg, outc_ // 4, outc_ // 4, 3, 1, 1, 'relu', 0.0),
            conv7X7_2=_conv_bn(kg, outc_ // 4, outc_ // 4, 3, 1, 1, 'leaky', l),
            conv7x7_3=_conv_bn(kg, outc_ // 4, outc_ // 4, 3, 1, 1, 'relu', 0.0),
        )

    sshs = [make_ssh(outc, outc) for _ in range(3)]
    anchor_num = 2
    class_head = [_head_conv(kg, outc, anchor_num * 2) for _ in range(3)]
    bbox_head = [_head_conv(kg, outc, anchor_num * 4) for _ in range(3)]
    ldm_head = [_head_conv(kg, outc, anchor_num * 10) for _ in range(3)]
    heads = _build_fused_heads(class_head, bbox_head, ldm_head)
    return dict(body=body, fpn=fpn, ssh=sshs, heads=heads)


# ---------------------------------------------------------------------------
# Forward pass (mirrors RetinaFace.forward for phase='test')
# ---------------------------------------------------------------------------

def _ssh_forward(x, p):
    c3 = _apply_layer(x, p['conv3X3'])
    c5_1 = _apply_layer(x, p['conv5X5_1'])
    c5 = _apply_layer(c5_1, p['conv5X5_2'])
    c7_2 = _apply_layer(c5_1, p['conv7X7_2'])
    c7 = _apply_layer(c7_2, p['conv7x7_3'])
    # post-concat ReLU already applied per branch (elementwise, identical result)
    return jnp.concatenate([c3, c5, c7], axis=-1)


def retinaface_forward(params, inputs_nchw):
    """inputs_nchw: (N, 3, H, W) float32 (PyTorch NCHW convention).
    Returns (bbox_regressions, softmax(classifications), ldm_regressions)."""
    x = jnp.transpose(inputs_nchw, (0, 2, 3, 1))     # -> NHWC

    # body: MobileNetV1-0.25, IntermediateLayerGetter over stage1/2/3
    feats = []
    h = x
    for stage in ('stage1', 'stage2', 'stage3'):
        for layer in params['body'][stage]:
            h = _apply_layer(h, layer)
        feats.append(h)
    out1, out2, out3 = feats

    # FPN (top-down adds fused into the lateral 1x1 conv epilogues)
    fpn = params['fpn']
    o3 = _apply_layer(out3, fpn['output3'])
    up3 = _nearest_resize(o3, out2.shape[1], out2.shape[2])
    o2 = _apply_layer(out2, fpn['output2'], residual=up3)
    o2 = _apply_layer(o2, fpn['merge2'])
    up2 = _nearest_resize(o2, out1.shape[1], out1.shape[2])
    o1 = _apply_layer(out1, fpn['output1'], residual=up2)
    o1 = _apply_layer(o1, fpn['merge1'])

    # SSH modules
    features = [_ssh_forward(f, params['ssh'][i]) for i, f in enumerate([o1, o2, o3])]

    # Fused heads: columns [0:8]=bbox, [8:12]=class probabilities, [12:32]=landmarks
    outs = [_fused_head_forward(f, hp['w'], hp['bias'], hp['mask'])
            for f, hp in zip(features, params['heads'])]
    n = outs[0].shape[0]
    bbox = jnp.concatenate([o[..., 0:8].reshape(n, -1, 4) for o in outs], axis=1)
    cls = jnp.concatenate([o[..., 8:12].reshape(n, -1, 2) for o in outs], axis=1)
    ldm = jnp.concatenate([o[..., 12:32].reshape(n, -1, 10) for o in outs], axis=1)
    return bbox, cls, ldm


if __name__ == "__main__":
    params = init_retinaface_params(seed=0)
    x = jax.random.normal(jax.random.PRNGKey(0), (2, 3, 32, 32), jnp.float32)

    bbox, cls, ldm = retinaface_forward(params, x)
    jax.block_until_ready((bbox, cls, ldm))

    # 32x32 input -> feature maps 4x4, 2x2, 1x1; 2 anchors each -> 42 anchors total
    assert bbox.shape == (2, 42, 4), bbox.shape
    assert cls.shape == (2, 42, 2), cls.shape
    assert ldm.shape == (2, 42, 10), ldm.shape
    assert bool(jnp.all(jnp.isfinite(bbox)))
    assert bool(jnp.all(jnp.isfinite(cls)))
    assert bool(jnp.all(jnp.isfinite(ldm)))
    # softmax rows sum to 1
    assert bool(jnp.allclose(jnp.sum(cls, axis=-1), 1.0, atol=1e-5))

    print("KERNEL_OK")
</pallas_src>

<mosaic_0001>
module attributes {stable_mosaic.version = 11 : i64} {
  func.func @_conv_matmul_kernel(%arg0: i32, %arg1: memref<512x27xbf16, #tpu.memory_space<vmem>>, %arg2: memref<27x128xbf16, #tpu.memory_space<vmem>>, %arg3: memref<1x128xf32, #tpu.memory_space<vmem>>, %arg4: memref<1x128xf32, #tpu.memory_space<vmem>>, %arg5: memref<512x128xf32, #tpu.memory_space<vmem>>) attributes {dimension_semantics = [#tpu.dimension_semantics<parallel>], iteration_bounds = array<i64: 1>, scalar_prefetch = 0 : i64, scratch_operands = 0 : i64, tpu.core_type = #tpu.core_type<tc>, window_params = [{transform_indices = @transform_0, window_bounds = array<i64: 512, 27>}, {pipeline_mode = #tpu.pipeline_mode<synchronous>, transform_indices = @transform_1, window_bounds = array<i64: 27, 128>}, {pipeline_mode = #tpu.pipeline_mode<synchronous>, transform_indices = @transform_2, window_bounds = array<i64: 1, 128>}, {pipeline_mode = #tpu.pipeline_mode<synchronous>, transform_indices = @transform_3, window_bounds = array<i64: 1, 128>}, {transform_indices = @transform_4, window_bounds = array<i64: 512, 128>}]} {
    %c0 = arith.constant 0 : index
    %c0_0 = arith.constant 0 : index
    %0 = vector.load %arg1[%c0, %c0_0] : memref<512x27xbf16, #tpu.memory_space<vmem>>, vector<512x27xbf16>
    %c0_1 = arith.constant 0 : index
    %c0_2 = arith.constant 0 : index
    %1 = vector.load %arg2[%c0_1, %c0_2] : memref<27x128xbf16, #tpu.memory_space<vmem>>, vector<27x128xbf16>
    %cst = arith.constant dense<0.000000e+00> : vector<512x128xf32>
    %2 = tpu.matmul %0, %1, %cst {dimension_numbers = #tpu.dot_dimension_numbers<[1], [0], [0], [1], [0, 0, 1, 1], [], []>} : vector<512x27xbf16>, vector<27x128xbf16>, vector<512x128xf32> -> vector<512x128xf32>
    %c0_3 = arith.constant 0 : index
    %c0_4 = arith.constant 0 : index
    %3 = vector.load %arg3[%c0_3, %c0_4] : memref<1x128xf32, #tpu.memory_space<vmem>>, vector<1x128xf32>
    %4 = vector.broadcast %3 : vector<1x128xf32> to vector<512x128xf32>
    %5 = arith.mulf %2, %4 : vector<512x128xf32>
    %c0_5 = arith.constant 0 : index
    %c0_6 = arith.constant 0 : index
    %6 = vector.load %arg4[%c0_5, %c0_6] : memref<1x128xf32, #tpu.memory_space<vmem>>, vector<1x128xf32>
    %7 = vector.broadcast %6 : vector<1x128xf32> to vector<512x128xf32>
    %8 = arith.addf %5, %7 : vector<512x128xf32>
    %cst_7 = arith.constant 1.000000e-01 : f32
    %9 = vector.broadcast %cst_7 : f32 to vector<512x128xf32>
    %10 = arith.mulf %8, %9 : vector<512x128xf32>
    %11 = arith.maximumf %8, %10 : vector<512x128xf32>
    %c0_8 = arith.constant 0 : index
    %c0_9 = arith.constant 0 : index
    %12 = vector.load %arg5[%c0_8, %c0_9] : memref<512x128xf32, #tpu.memory_space<vmem>>, vector<512x128xf32>
    tpu.vector_store %arg5[%c0_8, %c0_9], %11 {strides = array<i32>} : memref<512x128xf32, #tpu.memory_space<vmem>>, vector<512x128xf32>,
    return
  }
  func.func @transform_0(%arg0: i32) -> (i32, i32) {
    %c0_i32 = arith.constant 0 : i32
    %c0_i32_0 = arith.constant 0 : i32
    return %arg0, %c0_i32 : i32, i32
  }
  func.func @transform_1(%arg0: i32) -> (i32, i32) {
    %c0_i32 = arith.constant 0 : i32
    %c0_i32_0 = arith.constant 0 : i32
    %c0_i32_1 = arith.constant 0 : i32
    return %c0_i32, %c0_i32_0 : i32, i32
  }
  func.func @transform_2(%arg0: i32) -> (i32, i32) {
    %c0_i32 = arith.constant 0 : i32
    %c0_i32_0 = arith.constant 0 : i32
    %c0_i32_1 = arith.constant 0 : i32
    return %c0_i32, %c0_i32_0 : i32, i32
  }
  func.func @transform_3(%arg0: i32) -> (i32, i32) {
    %c0_i32 = arith.constant 0 : i32
    %c0_i32_0 = arith.constant 0 : i32
    %c0_i32_1 = arith.constant 0 : i32
    return %c0_i32, %c0_i32_0 : i32, i32
  }
  func.func @transform_4(%arg0: i32) -> (i32, i32) {
    %c0_i32 = arith.constant 0 : i32
    %c0_i32_0 = arith.constant 0 : i32
    return %arg0, %c0_i32 : i32, i32
  }
}

</mosaic_0001>

<bundles_post_ra>
// kernel: _conv2d_bn_act.1
= control target key start
LH: loop header
LB: loop body
LE: loop exit
PB: predicated region body
PF: predicated region fallthrough
CT: control target
= control target key end

     0   :  { %vm354_vm0 = vcmask 1044480   ;;  %vm355_vm1 = vcmask 1045504   ;;  %vm257_vm2 = vcmask 220160   ;;  %v1197_v1 = vmov 65535   ;;  %s1687_s1 = inlined_call_operand.vmem [shape: bf16[27,128], index: 1, kind: input, shape index: {}]   ;;  %s1688_s0 = inlined_call_operand.vmem [shape: bf16[512,27], index: 0, kind: input, shape index: {}]   ;;  %s1689_s2 = inlined_call_operand.vmem [shape: f32[1,128], index: 2, kind: input, shape index: {}]   ;;  %s1690_s3 = inlined_call_operand.vmem [shape: f32[1,128], index: 3, kind: input, shape index: {}]   ;;  %s1691_s4 = inlined_call_operand.vmem [shape: f32[512,128], index: 4, kind: output, shape index: {}]  }
   0x1   :  { %v1163_v0 = vld [vmem:[%s1687_s1] sm:$0xff]   ;;  %v356_v2 = vsel %vm354_vm0, 4294967295, %v1197_v1  ;;  %v1164_v3 = vld [vmem:[%s1687_s1 + $0x8] sm:$0x3f]   ;;  %v1169_v10 = vld [vmem:[%s1688_s0 + $0x10] sm:$0xff]  }
   0x2   :  { %1090 = vmatprep.subr.bf16.mxu0 %v1163_v0  ;;  %1158 = vmatprep.subr.bf16.mxu1 %v1163_v0  ;;  %v357_v4 = vsel %vm355_vm1, %v356_v2, 0  ;;  %v1165_v5 = vld [vmem:[%s1688_s0] sm:$0xff]   ;;  %v1167_v8 = vld [vmem:[%s1688_s0 + $0x8] sm:$0xff]   ;;  %v1170_v11 = vld [vmem:[%s1688_s0 + $0x90] sm:$0xff]  }
   0x3   :  { %1091 = vmatpush3.bf16.msra.mxu0 %v1163_v0  ;;  %1160 = vmatpush3.bf16.msra.mxu1 %v1163_v0  ;;  %v359_v6 = vand.u32 %v1164_v3, %v357_v4  ;;  %v1166_v7 = vld [vmem:[%s1688_s0 + $0x80] sm:$0xff]   ;;  %v1168_v9 = vld [vmem:[%s1688_s0 + $0x88] sm:$0xff]   ;;  %v1171_v12 = vld [vmem:[%s1688_s0 + $0x18] sm:$0xff]  }
   0x4   :  { %1094 = vmatprep.mubr.msk.bf16.mxu0 %vm257_vm2, %v1165_v5  ;;  %1126 = vmatprep.mubr.msk.bf16.mxu1 %vm257_vm2, %v1166_v7  ;;  %v1172_v13 = vld [vmem:[%s1688_s0 + $0x98] sm:$0xff]   ;;  %v1173_v14 = vld [vmem:[%s1688_s0 + $0x20] sm:$0xff]   ;;  %v1175_v16 = vld [vmem:[%s1688_s0 + $0x28] sm:$0xff]  }
   0x5   :  { %1092 = vmatprep.subr.bf16.mxu0 %v359_v6  ;;  %1159 = vmatprep.subr.bf16.mxu1 %v359_v6  ;;  %v1174_v15 = vld [vmem:[%s1688_s0 + $0xa0] sm:$0xff]   ;;  %v1176_v17 = vld [vmem:[%s1688_s0 + $0xa8] sm:$0xff]   ;;  %v1177_v18 = vld [vmem:[%s1688_s0 + $0x30] sm:$0xff]  }
   0x6   :  { %v1178_v19 = vld [vmem:[%s1688_s0 + $0xb0] sm:$0xff]   ;;  %v1179_v20 = vld [vmem:[%s1688_s0 + $0x38] sm:$0xff]   ;;  %v1181_v22 = vld [vmem:[%s1688_s0 + $0x40] sm:$0xff]  }
   0x7   :  { %1093 = vmatpush3.bf16.msra.mxu0 %v359_v6  ;;  %1161 = vmatpush3.bf16.msra.mxu1 %v359_v6  ;;  %v1180_v21 = vld [vmem:[%s1688_s0 + $0xb8] sm:$0xff]   ;;  %v1182_v23 = vld [vmem:[%s1688_s0 + $0xc0] sm:$0xff]   ;;  %v1183_v24 = vld [vmem:[%s1688_s0 + $0x48] sm:$0xff]  }
   0x8   :  { %v1184_v25 = vld [vmem:[%s1688_s0 + $0xc8] sm:$0xff]   ;;  %v1185_v26 = vld [vmem:[%s1688_s0 + $0x50] sm:$0xff]   ;;  %v1187_v28 = vld [vmem:[%s1688_s0 + $0x58] sm:$0xff]  }
   0x9   :  { %v1186_v27 = vld [vmem:[%s1688_s0 + $0xd0] sm:$0xff]   ;;  %v1188_v29 = vld [vmem:[%s1688_s0 + $0xd8] sm:$0xff]   ;;  %v1189_v30 = vld [vmem:[%s1688_s0 + $0x60] sm:$0xff]  }
   0xa   :  { %1095 = vmatmul.mubr.msk.bf16.vlgmr.msra.gmra.mrb[0].mxu0 %vm257_vm2, %v1167_v8  ;;  %1127 = vmatmul.mubr.msk.bf16.vlgmr.msra.gmra.mrb[0].mxu1 %vm257_vm2, %v1168_v9  ;;  %v1190_v31 = vld [vmem:[%s1688_s0 + $0xe0] sm:$0xff]   ;;  %v1191_v32 = vld [vmem:[%s1688_s0 + $0x68] sm:$0xff]   ;;  %v1193_v34 = vld [vmem:[%s1688_s0 + $0x70] sm:$0xff]  }
   0xb   :  { %1098 = vmatprep.mubr.msk.bf16.mxu0 %vm257_vm2, %v1169_v10  ;;  %1130 = vmatprep.mubr.msk.bf16.mxu1 %vm257_vm2, %v1170_v11  ;;  %v1192_v33 = vld [vmem:[%s1688_s0 + $0xe8] sm:$0xff]   ;;  %v1194_v35 = vld [vmem:[%s1688_s0 + $0xf0] sm:$0xff]   ;;  %v1195_v36 = vld [vmem:[%s1688_s0 + $0x78] sm:$0xff]  }
   0xc   :  { %v1196_v37 = vld [vmem:[%s1688_s0 + $0xf8] sm:$0xff]   ;;  %v1360_v38 = vld [vmem:[%s1689_s2] ss:$0 sm:$0xff] }
   0xd   :  { %v1365_v40 = vld [vmem:[%s1690_s3] ss:$0 sm:$0xff] }
  0x12   :  { %1099 = vmatmul.mubr.msk.bf16.gmra.mrb[4].mxu0 %vm257_vm2, %v1171_v12  ;;  %1131 = vmatmul.mubr.msk.bf16.gmra.mrb[4].mxu1 %vm257_vm2, %v1172_v13 }
  0x13   :  { %1102 = vmatprep.mubr.msk.bf16.mxu0 %vm257_vm2, %v1173_v14  ;;  %1134 = vmatprep.mubr.msk.bf16.mxu1 %vm257_vm2, %v1174_v15 }
  0x1a   :  { %1103 = vmatmul.mubr.msk.bf16.gmra.mrb[8].mxu0 %vm257_vm2, %v1175_v16  ;;  %1135 = vmatmul.mubr.msk.bf16.gmra.mrb[8].mxu1 %vm257_vm2, %v1176_v17 }
  0x1b   :  { %1106 = vmatprep.mubr.msk.bf16.mxu0 %vm257_vm2, %v1177_v18  ;;  %1138 = vmatprep.mubr.msk.bf16.mxu1 %vm257_vm2, %v1178_v19 }
  0x22   :  { %1107 = vmatmul.mubr.msk.bf16.gmra.mrb[12].mxu0 %vm257_vm2, %v1179_v20  ;;  %1139 = vmatmul.mubr.msk.bf16.gmra.mrb[12].mxu1 %vm257_vm2, %v1180_v21 }
  0x23   :  { %1110 = vmatprep.mubr.msk.bf16.mxu0 %vm257_vm2, %v1181_v22  ;;  %1142 = vmatprep.mubr.msk.bf16.mxu1 %vm257_vm2, %v1182_v23 }
  0x2a   :  { %1111 = vmatmul.mubr.msk.bf16.gmra.mrb[16].mxu0 %vm257_vm2, %v1183_v24  ;;  %1143 = vmatmul.mubr.msk.bf16.gmra.mrb[16].mxu1 %vm257_vm2, %v1184_v25 }
  0x2b   :  { %1114 = vmatprep.mubr.msk.bf16.mxu0 %vm257_vm2, %v1185_v26  ;;  %1146 = vmatprep.mubr.msk.bf16.mxu1 %vm257_vm2, %v1186_v27 }
  0x32   :  { %1115 = vmatmul.mubr.msk.bf16.gmra.mrb[20].mxu0 %vm257_vm2, %v1187_v28  ;;  %1147 = vmatmul.mubr.msk.bf16.gmra.mrb[20].mxu1 %vm257_vm2, %v1188_v29 }
  0x33   :  { %1118 = vmatprep.mubr.msk.bf16.mxu0 %vm257_vm2, %v1189_v30  ;;  %1150 = vmatprep.mubr.msk.bf16.mxu1 %vm257_vm2, %v1190_v31 }
  0x3a   :  { %1119 = vmatmul.mubr.msk.bf16.gmra.mrb[24].mxu0 %vm257_vm2, %v1191_v32  ;;  %1151 = vmatmul.mubr.msk.bf16.gmra.mrb[24].mxu1 %vm257_vm2, %v1192_v33 }
  0x3b   :  { %1122 = vmatprep.mubr.msk.bf16.mxu0 %vm257_vm2, %v1193_v34  ;;  %1154 = vmatprep.mubr.msk.bf16.mxu1 %vm257_vm2, %v1194_v35 }
  0x42   :  { %1123 = vmatmul.mubr.msk.bf16.gmra.mrb[28].mxu0 %vm257_vm2, %v1195_v36  ;;  %1155 = vmatmul.mubr.msk.bf16.gmra.mrb[28].mxu1 %vm257_vm2, %v1196_v37 }
  0xdd   :  { %v1096_v39 = vpop.f32.mrb[0].mxu0  ;;  %v1128_v41 = vpop.f32.mrb[0].mxu1 }
  0xde   :  { %v659_v42 = vmul.f32 %v1096_v39, %v1360_v38  ;;  %v691_v43 = vmul.f32 %v1128_v41, %v1360_v38  ;;  %v395_v44 = vpop.f32.mrb[1].mxu0  ;;  %v523_v45 = vpop.f32.mrb[1].mxu1 }
  0xdf   :  { %v657_v46 = vmul.f32 %v1360_v38, %v395_v44  ;;  %v689_v47 = vmul.f32 %v1360_v38, %v523_v45  ;;  %v1097_v48 = vpop.f32.mrb[2].mxu0  ;;  %v1129_v49 = vpop.f32.mrb[2].mxu1 }
  0xe0   :  { %v730_v50 = vadd.f32 %v1365_v40, %v659_v42  ;;  %v762_v51 = vadd.f32 %v1365_v40, %v691_v43  ;;  %v660_v52 = vmul.f32 %v1097_v48, %v1360_v38  ;;  %v692_v53 = vmul.f32 %v1129_v49, %v1360_v38  ;;  %v398_v54 = vpop.f32.mrb[3].mxu0  ;;  %v526_v55 = vpop.f32.mrb[3].mxu1 }
  0xe1   :  { %v728_v56 = vadd.f32 %v1365_v40, %v657_v46  ;;  %v760_v57 = vadd.f32 %v1365_v40, %v689_v47  ;;  %v658_v58 = vmul.f32 %v1360_v38, %v398_v54  ;;  %v690_v59 = vmul.f32 %v1360_v38, %v526_v55 }
  0xe2   :  { %v794_v60 = vmul.f32 0.1, %v730_v50  ;;  %v826_v61 = vmul.f32 0.1, %v762_v51  ;;  %v731_v62 = vadd.f32 %v1365_v40, %v660_v52  ;;  %v763_v63 = vadd.f32 %v1365_v40, %v692_v53 }
  0xe3   :  { %v792_v0 = vmul.f32 0.1, %v728_v56  ;;  %v824_v1 = vmul.f32 0.1, %v760_v57  ;;  %v729_v2 = vadd.f32 %v1365_v40, %v658_v58  ;;  %v761_v3 = vadd.f32 %v1365_v40, %v690_v59 }
  0xe4   :  { %v858_v4 = vmax.f32 %v730_v50, %v794_v60  ;;  %v890_v5 = vmax.f32 %v762_v51, %v826_v61  ;;  %v795_v6 = vmul.f32 0.1, %v731_v62  ;;  %v827_v7 = vmul.f32 0.1, %v763_v63 }
  0xe5   :  { %v856_v8 = vmax.f32 %v728_v56, %v792_v0  ;;  %v888_v9 = vmax.f32 %v760_v57, %v824_v1  ;;  %v793_v10 = vmul.f32 0.1, %v729_v2  ;;  %v825_v11 = vmul.f32 0.1, %v761_v3  ;;  %v1100_v12 = vpop.f32.mrb[4].mxu0  ;;  %v1132_v13 = vpop.f32.mrb[4].mxu1 }
  0xe6   :  { %922 = vst [vmem:[%s1691_s4 + $0x10] sm:$0xff] %v858_v4  ;;  %954 = vst [vmem:[%s1691_s4 + $0x110] sm:$0xff] %v890_v5  ;;  %v859_v14 = vmax.f32 %v731_v62, %v795_v6  ;;  %v891_v15 = vmax.f32 %v763_v63, %v827_v7  ;;  %v663_v16 = vmul.f32 %v1100_v12, %v1360_v38  ;;  %v411_v18 = vpop.f32.mrb[5].mxu0  ;;  %v539_v19 = vpop.f32.mrb[5].mxu1 }
  0xe7   :  { %v695_v17 = vmul.f32 %v1132_v13, %v1360_v38  ;;  %920 = vst [vmem:[%s1691_s4] sm:$0xff] %v856_v8  ;;  %952 = vst [vmem:[%s1691_s4 + $0x100] sm:$0xff] %v888_v9  ;;  %v857_v20 = vmax.f32 %v729_v2, %v793_v10  ;;  %v889_v21 = vmax.f32 %v761_v3, %v825_v11  ;;  %v1101_v24 = vpop.f32.mrb[6].mxu0  ;;  %v1133_v25 = vpop.f32.mrb[6].mxu1 }
  0xe8   :  { %v661_v22 = vmul.f32 %v1360_v38, %v411_v18  ;;  %v693_v23 = vmul.f32 %v1360_v38, %v539_v19  ;;  %923 = vst [vmem:[%s1691_s4 + $0x18] sm:$0xff] %v859_v14  ;;  %955 = vst [vmem:[%s1691_s4 + $0x118] sm:$0xff] %v891_v15  ;;  %v734_v26 = vadd.f32 %v1365_v40, %v663_v16  ;;  %v414_v30 = vpop.f32.mrb[7].mxu0  ;;  %v542_v31 = vpop.f32.mrb[7].mxu1 }
  0xe9   :  { %v766_v27 = vadd.f32 %v1365_v40, %v695_v17  ;;  %v664_v28 = vmul.f32 %v1101_v24, %v1360_v38  ;;  %v696_v29 = vmul.f32 %v1133_v25, %v1360_v38  ;;  %921 = vst [vmem:[%s1691_s4 + $0x8] sm:$0xff] %v857_v20  ;;  %953 = vst [vmem:[%s1691_s4 + $0x108] sm:$0xff] %v889_v21 }
  0xea   :  { %v732_v32 = vadd.f32 %v1365_v40, %v661_v22  ;;  %v764_v33 = vadd.f32 %v1365_v40, %v693_v23  ;;  %v662_v34 = vmul.f32 %v1360_v38, %v414_v30  ;;  %v694_v35 = vmul.f32 %v1360_v38, %v542_v31 }
  0xeb   :  { %v798_v36 = vmul.f32 0.1, %v734_v26  ;;  %v830_v37 = vmul.f32 0.1, %v766_v27  ;;  %v735_v39 = vadd.f32 %v1365_v40, %v664_v28  ;;  %v767_v41 = vadd.f32 %v1365_v40, %v696_v29 }
  0xec   :  { %v796_v42 = vmul.f32 0.1, %v732_v32  ;;  %v828_v43 = vmul.f32 0.1, %v764_v33  ;;  %v733_v44 = vadd.f32 %v1365_v40, %v662_v34  ;;  %v765_v45 = vadd.f32 %v1365_v40, %v694_v35 }
  0xed   :  { %v862_v46 = vmax.f32 %v734_v26, %v798_v36  ;;  %v894_v47 = vmax.f32 %v766_v27, %v830_v37  ;;  %v799_v48 = vmul.f32 0.1, %v735_v39  ;;  %v831_v49 = vmul.f32 0.1, %v767_v41  ;;  %v1104_v54 = vpop.f32.mrb[8].mxu0  ;;  %v1136_v55 = vpop.f32.mrb[8].mxu1 }
  0xee   :  { %v860_v50 = vmax.f32 %v732_v32, %v796_v42  ;;  %v892_v51 = vmax.f32 %v764_v33, %v828_v43  ;;  %v797_v52 = vmul.f32 0.1, %v733_v44  ;;  %v829_v53 = vmul.f32 0.1, %v765_v45  ;;  %v427_v60 = vpop.f32.mrb[9].mxu0  ;;  %v555_v61 = vpop.f32.mrb[9].mxu1 }
  0xef   :  { %926 = vst [vmem:[%s1691_s4 + $0x30] sm:$0xff] %v862_v46  ;;  %958 = vst [vmem:[%s1691_s4 + $0x130] sm:$0xff] %v894_v47  ;;  %v863_v56 = vmax.f32 %v735_v39, %v799_v48  ;;  %v895_v57 = vmax.f32 %v767_v41, %v831_v49  ;;  %v667_v58 = vmul.f32 %v1104_v54, %v1360_v38  ;;  %v1105_v2 = vpop.f32.mrb[10].mxu0  ;;  %v1137_v3 = vpop.f32.mrb[10].mxu1 }
  0xf0   :  { %v699_v59 = vmul.f32 %v1136_v55, %v1360_v38  ;;  %924 = vst [vmem:[%s1691_s4 + $0x20] sm:$0xff] %v860_v50  ;;  %956 = vst [vmem:[%s1691_s4 + $0x120] sm:$0xff] %v892_v51  ;;  %v861_v62 = vmax.f32 %v733_v44, %v797_v52  ;;  %v893_v63 = vmax.f32 %v765_v45, %v829_v53  ;;  %v430_v8 = vpop.f32.mrb[11].mxu0  ;;  %v558_v9 = vpop.f32.mrb[11].mxu1 }
  0xf1   :  { %v665_v0 = vmul.f32 %v1360_v38, %v427_v60  ;;  %v697_v1 = vmul.f32 %v1360_v38, %v555_v61  ;;  %927 = vst [vmem:[%s1691_s4 + $0x38] sm:$0xff] %v863_v56  ;;  %959 = vst [vmem:[%s1691_s4 + $0x138] sm:$0xff] %v895_v57  ;;  %v738_v4 = vadd.f32 %v1365_v40, %v667_v58 }
  0xf2   :  { %v770_v5 = vadd.f32 %v1365_v40, %v699_v59  ;;  %v668_v6 = vmul.f32 %v1105_v2, %v1360_v38  ;;  %v700_v7 = vmul.f32 %v1137_v3, %v1360_v38  ;;  %925 = vst [vmem:[%s1691_s4 + $0x28] sm:$0xff] %v861_v62  ;;  %957 = vst [vmem:[%s1691_s4 + $0x128] sm:$0xff] %v893_v63 }
  0xf3   :  { %v736_v10 = vadd.f32 %v1365_v40, %v665_v0  ;;  %v768_v11 = vadd.f32 %v1365_v40, %v697_v1  ;;  %v666_v12 = vmul.f32 %v1360_v38, %v430_v8  ;;  %v698_v13 = vmul.f32 %v1360_v38, %v558_v9 }
  0xf4   :  { %v802_v14 = vmul.f32 0.1, %v738_v4  ;;  %v834_v15 = vmul.f32 0.1, %v770_v5  ;;  %v739_v16 = vadd.f32 %v1365_v40, %v668_v6  ;;  %v771_v17 = vadd.f32 %v1365_v40, %v700_v7 }
  0xf5   :  { %v800_v18 = vmul.f32 0.1, %v736_v10  ;;  %v832_v19 = vmul.f32 0.1, %v768_v11  ;;  %v737_v20 = vadd.f32 %v1365_v40, %v666_v12  ;;  %v769_v21 = vadd.f32 %v1365_v40, %v698_v13  ;;  %v1108_v30 = vpop.f32.mrb[12].mxu0  ;;  %v1140_v31 = vpop.f32.mrb[12].mxu1 }
  0xf6   :  { %v866_v22 = vmax.f32 %v738_v4, %v802_v14  ;;  %v898_v23 = vmax.f32 %v770_v5, %v834_v15  ;;  %v803_v24 = vmul.f32 0.1, %v739_v16  ;;  %v835_v25 = vmul.f32 0.1, %v771_v17  ;;  %v443_v36 = vpop.f32.mrb[13].mxu0  ;;  %v571_v37 = vpop.f32.mrb[13].mxu1 }
  0xf7   :  { %v864_v26 = vmax.f32 %v736_v10, %v800_v18  ;;  %v896_v27 = vmax.f32 %v768_v11, %v832_v19  ;;  %v801_v28 = vmul.f32 0.1, %v737_v20  ;;  %v833_v29 = vmul.f32 0.1, %v769_v21  ;;  %v1109_v44 = vpop.f32.mrb[14].mxu0  ;;  %v1141_v45 = vpop.f32.mrb[14].mxu1 }
  0xf8   :  { %930 = vst [vmem:[%s1691_s4 + $0x50] sm:$0xff] %v866_v22  ;;  %962 = vst [vmem:[%s1691_s4 + $0x150] sm:$0xff] %v898_v23  ;;  %v867_v32 = vmax.f32 %v739_v16, %v803_v24  ;;  %v899_v33 = vmax.f32 %v771_v17, %v835_v25  ;;  %v671_v34 = vmul.f32 %v1108_v30, %v1360_v38  ;;  %v446_v50 = vpop.f32.mrb[15].mxu0  ;;  %v574_v51 = vpop.f32.mrb[15].mxu1 }
  0xf9   :  { %v703_v35 = vmul.f32 %v1140_v31, %v1360_v38  ;;  %928 = vst [vmem:[%s1691_s4 + $0x40] sm:$0xff] %v864_v26  ;;  %960 = vst [vmem:[%s1691_s4 + $0x140] sm:$0xff] %v896_v27  ;;  %v865_v39 = vmax.f32 %v737_v20, %v801_v28  ;;  %v897_v41 = vmax.f32 %v769_v21, %v833_v29 }
  0xfa   :  { %v669_v42 = vmul.f32 %v1360_v38, %v443_v36  ;;  %v701_v43 = vmul.f32 %v1360_v38, %v571_v37  ;;  %931 = vst [vmem:[%s1691_s4 + $0x58] sm:$0xff] %v867_v32  ;;  %963 = vst [vmem:[%s1691_s4 + $0x158] sm:$0xff] %v899_v33  ;;  %v742_v46 = vadd.f32 %v1365_v40, %v671_v34 }
  0xfb   :  { %v774_v47 = vadd.f32 %v1365_v40, %v703_v35  ;;  %v672_v48 = vmul.f32 %v1109_v44, %v1360_v38  ;;  %v704_v49 = vmul.f32 %v1141_v45, %v1360_v38  ;;  %929 = vst [vmem:[%s1691_s4 + $0x48] sm:$0xff] %v865_v39  ;;  %961 = vst [vmem:[%s1691_s4 + $0x148] sm:$0xff] %v897_v41 }
  0xfc   :  { %v740_v52 = vadd.f32 %v1365_v40, %v669_v42  ;;  %v772_v53 = vadd.f32 %v1365_v40, %v701_v43  ;;  %v670_v54 = vmul.f32 %v1360_v38, %v446_v50  ;;  %v702_v55 = vmul.f32 %v1360_v38, %v574_v51 }
  0xfd   :  { %v806_v56 = vmul.f32 0.1, %v742_v46  ;;  %v838_v57 = vmul.f32 0.1, %v774_v47  ;;  %v743_v58 = vadd.f32 %v1365_v40, %v672_v48  ;;  %v775_v59 = vadd.f32 %v1365_v40, %v704_v49  ;;  %v1112_v8 = vpop.f32.mrb[16].mxu0  ;;  %v1144_v9 = vpop.f32.mrb[16].mxu1 }
  0xfe   :  { %v804_v60 = vmul.f32 0.1, %v740_v52  ;;  %v836_v61 = vmul.f32 0.1, %v772_v53  ;;  %v741_v62 = vadd.f32 %v1365_v40, %v670_v54  ;;  %v773_v63 = vadd.f32 %v1365_v40, %v702_v55  ;;  %v459_v14 = vpop.f32.mrb[17].mxu0  ;;  %v587_v15 = vpop.f32.mrb[17].mxu1 }
  0xff   :  { %v870_v0 = vmax.f32 %v742_v46, %v806_v56  ;;  %v902_v1 = vmax.f32 %v774_v47, %v838_v57  ;;  %v807_v2 = vmul.f32 0.1, %v743_v58  ;;  %v839_v3 = vmul.f32 0.1, %v775_v59  ;;  %v1113_v20 = vpop.f32.mrb[18].mxu0  ;;  %v1145_v21 = vpop.f32.mrb[18].mxu1 }
 0x100   :  { %v868_v4 = vmax.f32 %v740_v52, %v804_v60  ;;  %v900_v5 = vmax.f32 %v772_v53, %v836_v61  ;;  %v805_v6 = vmul.f32 0.1, %v741_v62  ;;  %v837_v7 = vmul.f32 0.1, %v773_v63  ;;  %v462_v26 = vpop.f32.mrb[19].mxu0  ;;  %v590_v27 = vpop.f32.mrb[19].mxu1 }
 0x101   :  { %934 = vst [vmem:[%s1691_s4 + $0x70] sm:$0xff] %v870_v0  ;;  %966 = vst [vmem:[%s1691_s4 + $0x170] sm:$0xff] %v902_v1  ;;  %v871_v10 = vmax.f32 %v743_v58, %v807_v2  ;;  %v903_v11 = vmax.f32 %v775_v59, %v839_v3  ;;  %v675_v12 = vmul.f32 %v1112_v8, %v1360_v38 }
 0x102   :  { %v707_v13 = vmul.f32 %v1144_v9, %v1360_v38  ;;  %932 = vst [vmem:[%s1691_s4 + $0x60] sm:$0xff] %v868_v4  ;;  %964 = vst [vmem:[%s1691_s4 + $0x160] sm:$0xff] %v900_v5  ;;  %v869_v16 = vmax.f32 %v741_v62, %v805_v6  ;;  %v901_v17 = vmax.f32 %v773_v63, %v837_v7 }
 0x103   :  { %v673_v18 = vmul.f32 %v1360_v38, %v459_v14  ;;  %v705_v19 = vmul.f32 %v1360_v38, %v587_v15  ;;  %935 = vst [vmem:[%s1691_s4 + $0x78] sm:$0xff] %v871_v10  ;;  %967 = vst [vmem:[%s1691_s4 + $0x178] sm:$0xff] %v903_v11  ;;  %v746_v22 = vadd.f32 %v1365_v40, %v675_v12 }
 0x104   :  { %v778_v23 = vadd.f32 %v1365_v40, %v707_v13  ;;  %v676_v24 = vmul.f32 %v1113_v20, %v1360_v38  ;;  %v708_v25 = vmul.f32 %v1145_v21, %v1360_v38  ;;  %933 = vst [vmem:[%s1691_s4 + $0x68] sm:$0xff] %v869_v16  ;;  %965 = vst [vmem:[%s1691_s4 + $0x168] sm:$0xff] %v901_v17 }
 0x105   :  { %v744_v28 = vadd.f32 %v1365_v40, %v673_v18  ;;  %v776_v29 = vadd.f32 %v1365_v40, %v705_v19  ;;  %v674_v30 = vmul.f32 %v1360_v38, %v462_v26  ;;  %v706_v31 = vmul.f32 %v1360_v38, %v590_v27  ;;  %v1116_v50 = vpop.f32.mrb[20].mxu0  ;;  %v1148_v51 = vpop.f32.mrb[20].mxu1 }
 0x106   :  { %v810_v32 = vmul.f32 0.1, %v746_v22  ;;  %v842_v33 = vmul.f32 0.1, %v778_v23  ;;  %v747_v34 = vadd.f32 %v1365_v40, %v676_v24  ;;  %v779_v35 = vadd.f32 %v1365_v40, %v708_v25  ;;  %v475_v56 = vpop.f32.mrb[21].mxu0  ;;  %v603_v57 = vpop.f32.mrb[21].mxu1 }
 0x107   :  { %v808_v36 = vmul.f32 0.1, %v744_v28  ;;  %v840_v37 = vmul.f32 0.1, %v776_v29  ;;  %v745_v39 = vadd.f32 %v1365_v40, %v674_v30  ;;  %v777_v41 = vadd.f32 %v1365_v40, %v706_v31  ;;  %v1117_v62 = vpop.f32.mrb[22].mxu0  ;;  %v1149_v63 = vpop.f32.mrb[22].mxu1 }
 0x108   :  { %v874_v42 = vmax.f32 %v746_v22, %v810_v32  ;;  %v906_v43 = vmax.f32 %v778_v23, %v842_v33  ;;  %v811_v44 = vmul.f32 0.1, %v747_v34  ;;  %v843_v45 = vmul.f32 0.1, %v779_v35  ;;  %v478_v4 = vpop.f32.mrb[23].mxu0  ;;  %v606_v5 = vpop.f32.mrb[23].mxu1 }
 0x109   :  { %v872_v46 = vmax.f32 %v744_v28, %v808_v36  ;;  %v904_v47 = vmax.f32 %v776_v29, %v840_v37  ;;  %v809_v48 = vmul.f32 0.1, %v745_v39  ;;  %v841_v49 = vmul.f32 0.1, %v777_v41 }
 0x10a   :  { %938 = vst [vmem:[%s1691_s4 + $0x90] sm:$0xff] %v874_v42  ;;  %970 = vst [vmem:[%s1691_s4 + $0x190] sm:$0xff] %v906_v43  ;;  %v875_v52 = vmax.f32 %v747_v34, %v811_v44  ;;  %v907_v53 = vmax.f32 %v779_v35, %v843_v45  ;;  %v679_v54 = vmul.f32 %v1116_v50, %v1360_v38 }
 0x10b   :  { %v711_v55 = vmul.f32 %v1148_v51, %v1360_v38  ;;  %936 = vst [vmem:[%s1691_s4 + $0x80] sm:$0xff] %v872_v46  ;;  %968 = vst [vmem:[%s1691_s4 + $0x180] sm:$0xff] %v904_v47  ;;  %v873_v58 = vmax.f32 %v745_v39, %v809_v48  ;;  %v905_v59 = vmax.f32 %v777_v41, %v841_v49 }
 0x10c   :  { %v677_v60 = vmul.f32 %v1360_v38, %v475_v56  ;;  %v709_v61 = vmul.f32 %v1360_v38, %v603_v57  ;;  %939 = vst [vmem:[%s1691_s4 + $0x98] sm:$0xff] %v875_v52  ;;  %971 = vst [vmem:[%s1691_s4 + $0x198] sm:$0xff] %v907_v53  ;;  %v750_v0 = vadd.f32 %v1365_v40, %v679_v54 }
 0x10d   :  { %v782_v1 = vadd.f32 %v1365_v40, %v711_v55  ;;  %v680_v2 = vmul.f32 %v1117_v62, %v1360_v38  ;;  %v712_v3 = vmul.f32 %v1149_v63, %v1360_v38  ;;  %937 = vst [vmem:[%s1691_s4 + $0x88] sm:$0xff] %v873_v58  ;;  %969 = vst [vmem:[%s1691_s4 + $0x188] sm:$0xff] %v905_v59  ;;  %v1120_v26 = vpop.f32.mrb[24].mxu0  ;;  %v1152_v27 = vpop.f32.mrb[24].mxu1 }
 0x10e   :  { %v748_v6 = vadd.f32 %v1365_v40, %v677_v60  ;;  %v780_v7 = vadd.f32 %v1365_v40, %v709_v61  ;;  %v678_v8 = vmul.f32 %v1360_v38, %v478_v4  ;;  %v710_v9 = vmul.f32 %v1360_v38, %v606_v5  ;;  %v491_v32 = vpop.f32.mrb[25].mxu0  ;;  %v619_v33 = vpop.f32.mrb[25].mxu1 }
 0x10f   :  { %v814_v10 = vmul.f32 0.1, %v750_v0  ;;  %v846_v11 = vmul.f32 0.1, %v782_v1  ;;  %v751_v12 = vadd.f32 %v1365_v40, %v680_v2  ;;  %v783_v13 = vadd.f32 %v1365_v40, %v712_v3  ;;  %v1121_v39 = vpop.f32.mrb[26].mxu0  ;;  %v1153_v41 = vpop.f32.mrb[26].mxu1 }
 0x110   :  { %v812_v14 = vmul.f32 0.1, %v748_v6  ;;  %v844_v15 = vmul.f32 0.1, %v780_v7  ;;  %v749_v16 = vadd.f32 %v1365_v40, %v678_v8  ;;  %v781_v17 = vadd.f32 %v1365_v40, %v710_v9  ;;  %v494_v46 = vpop.f32.mrb[27].mxu0  ;;  %v622_v47 = vpop.f32.mrb[27].mxu1 }
 0x111   :  { %v878_v18 = vmax.f32 %v750_v0, %v814_v10  ;;  %v910_v19 = vmax.f32 %v782_v1, %v846_v11  ;;  %v815_v20 = vmul.f32 0.1, %v751_v12  ;;  %v847_v21 = vmul.f32 0.1, %v783_v13 }
 0x112   :  { %v876_v22 = vmax.f32 %v748_v6, %v812_v14  ;;  %v908_v23 = vmax.f32 %v780_v7, %v844_v15  ;;  %v813_v24 = vmul.f32 0.1, %v749_v16  ;;  %v845_v25 = vmul.f32 0.1, %v781_v17 }
 0x113   :  { %942 = vst [vmem:[%s1691_s4 + $0xb0] sm:$0xff] %v878_v18  ;;  %974 = vst [vmem:[%s1691_s4 + $0x1b0] sm:$0xff] %v910_v19  ;;  %v879_v28 = vmax.f32 %v751_v12, %v815_v20  ;;  %v911_v29 = vmax.f32 %v783_v13, %v847_v21  ;;  %v683_v30 = vmul.f32 %v1120_v26, %v1360_v38 }
 0x114   :  { %v715_v31 = vmul.f32 %v1152_v27, %v1360_v38  ;;  %940 = vst [vmem:[%s1691_s4 + $0xa0] sm:$0xff] %v876_v22  ;;  %972 = vst [vmem:[%s1691_s4 + $0x1a0] sm:$0xff] %v908_v23  ;;  %v877_v34 = vmax.f32 %v749_v16, %v813_v24  ;;  %v909_v35 = vmax.f32 %v781_v17, %v845_v25 }
 0x115   :  { %v681_v36 = vmul.f32 %v1360_v38, %v491_v32  ;;  %v713_v37 = vmul.f32 %v1360_v38, %v619_v33  ;;  %943 = vst [vmem:[%s1691_s4 + $0xb8] sm:$0xff] %v879_v28  ;;  %975 = vst [vmem:[%s1691_s4 + $0x1b8] sm:$0xff] %v911_v29  ;;  %v754_v42 = vadd.f32 %v1365_v40, %v683_v30  ;;  %v1124_v4 = vpop.f32.mrb[28].mxu0  ;;  %v1156_v5 = vpop.f32.mrb[28].mxu1 }
 0x116   :  { %v786_v43 = vadd.f32 %v1365_v40, %v715_v31  ;;  %v684_v44 = vmul.f32 %v1121_v39, %v1360_v38  ;;  %v716_v45 = vmul.f32 %v1153_v41, %v1360_v38  ;;  %941 = vst [vmem:[%s1691_s4 + $0xa8] sm:$0xff] %v877_v34  ;;  %973 = vst [vmem:[%s1691_s4 + $0x1a8] sm:$0xff] %v909_v35  ;;  %v507_v10 = vpop.f32.mrb[29].mxu0  ;;  %v635_v11 = vpop.f32.mrb[29].mxu1 }
 0x117   :  { %v752_v48 = vadd.f32 %v1365_v40, %v681_v36  ;;  %v784_v49 = vadd.f32 %v1365_v40, %v713_v37  ;;  %v682_v50 = vmul.f32 %v1360_v38, %v494_v46  ;;  %v714_v51 = vmul.f32 %v1360_v38, %v622_v47  ;;  %v1125_v16 = vpop.f32.mrb[30].mxu0  ;;  %v1157_v17 = vpop.f32.mrb[30].mxu1 }
 0x118   :  { %v818_v52 = vmul.f32 0.1, %v754_v42  ;;  %v850_v53 = vmul.f32 0.1, %v786_v43  ;;  %v755_v54 = vadd.f32 %v1365_v40, %v684_v44  ;;  %v787_v55 = vadd.f32 %v1365_v40, %v716_v45  ;;  %v510_v22 = vpop.f32.mrb[31].mxu0  ;;  %v638_v23 = vpop.f32.mrb[31].mxu1 }
 0x119   :  { %v816_v56 = vmul.f32 0.1, %v752_v48  ;;  %v848_v57 = vmul.f32 0.1, %v784_v49  ;;  %v753_v58 = vadd.f32 %v1365_v40, %v682_v50  ;;  %v785_v59 = vadd.f32 %v1365_v40, %v714_v51 }
 0x11a   :  { %v882_v60 = vmax.f32 %v754_v42, %v818_v52  ;;  %v914_v61 = vmax.f32 %v786_v43, %v850_v53  ;;  %v819_v62 = vmul.f32 0.1, %v755_v54  ;;  %v851_v63 = vmul.f32 0.1, %v787_v55 }
 0x11b   :  { %v880_v0 = vmax.f32 %v752_v48, %v816_v56  ;;  %v912_v1 = vmax.f32 %v784_v49, %v848_v57  ;;  %v817_v2 = vmul.f32 0.1, %v753_v58  ;;  %v849_v3 = vmul.f32 0.1, %v785_v59 }
 0x11c   :  { %946 = vst [vmem:[%s1691_s4 + $0xd0] sm:$0xff] %v882_v60  ;;  %978 = vst [vmem:[%s1691_s4 + $0x1d0] sm:$0xff] %v914_v61  ;;  %v883_v6 = vmax.f32 %v755_v54, %v819_v62  ;;  %v915_v7 = vmax.f32 %v787_v55, %v851_v63  ;;  %v687_v8 = vmul.f32 %v1124_v4, %v1360_v38 }
 0x11d   :  { %v719_v9 = vmul.f32 %v1156_v5, %v1360_v38  ;;  %944 = vst [vmem:[%s1691_s4 + $0xc0] sm:$0xff] %v880_v0  ;;  %976 = vst [vmem:[%s1691_s4 + $0x1c0] sm:$0xff] %v912_v1  ;;  %v881_v12 = vmax.f32 %v753_v58, %v817_v2  ;;  %v913_v13 = vmax.f32 %v785_v59, %v849_v3 }
 0x11e   :  { %v685_v14 = vmul.f32 %v1360_v38, %v507_v10  ;;  %v717_v15 = vmul.f32 %v1360_v38, %v635_v11  ;;  %947 = vst [vmem:[%s1691_s4 + $0xd8] sm:$0xff] %v883_v6  ;;  %979 = vst [vmem:[%s1691_s4 + $0x1d8] sm:$0xff] %v915_v7  ;;  %v758_v18 = vadd.f32 %v1365_v40, %v687_v8 }
 0x11f   :  { %v790_v19 = vadd.f32 %v1365_v40, %v719_v9  ;;  %v688_v20 = vmul.f32 %v1125_v16, %v1360_v38  ;;  %v720_v21 = vmul.f32 %v1157_v17, %v1360_v38  ;;  %945 = vst [vmem:[%s1691_s4 + $0xc8] sm:$0xff] %v881_v12  ;;  %977 = vst [vmem:[%s1691_s4 + $0x1c8] sm:$0xff] %v913_v13 }
 0x120   :  { %v756_v24 = vadd.f32 %v1365_v40, %v685_v14  ;;  %v788_v25 = vadd.f32 %v1365_v40, %v717_v15  ;;  %v686_v26 = vmul.f32 %v1360_v38, %v510_v22  ;;  %v718_v27 = vmul.f32 %v1360_v38, %v638_v23 }
 0x121   :  { %v822_v28 = vmul.f32 0.1, %v758_v18  ;;  %v854_v29 = vmul.f32 0.1, %v790_v19  ;;  %v759_v30 = vadd.f32 %v1365_v40, %v688_v20  ;;  %v791_v31 = vadd.f32 %v1365_v40, %v720_v21 }
 0x122   :  { %v820_v32 = vmul.f32 0.1, %v756_v24  ;;  %v852_v33 = vmul.f32 0.1, %v788_v25  ;;  %v757_v34 = vadd.f32 %v1365_v40, %v686_v26  ;;  %v789_v35 = vadd.f32 %v1365_v40, %v718_v27 }
 0x123   :  { %v886_v36 = vmax.f32 %v758_v18, %v822_v28  ;;  %v918_v37 = vmax.f32 %v790_v19, %v854_v29  ;;  %v823_v39 = vmul.f32 0.1, %v759_v30  ;;  %v855_v41 = vmul.f32 0.1, %v791_v31 }
 0x124   :  { %v884_v42 = vmax.f32 %v756_v24, %v820_v32  ;;  %v916_v43 = vmax.f32 %v788_v25, %v852_v33  ;;  %v821_v44 = vmul.f32 0.1, %v757_v34  ;;  %v853_v38 = vmul.f32 0.1, %v789_v35 }
 0x125   :  { %950 = vst [vmem:[%s1691_s4 + $0xf0] sm:$0xff] %v886_v36  ;;  %982 = vst [vmem:[%s1691_s4 + $0x1f0] sm:$0xff] %v918_v37  ;;  %v887_v45 = vmax.f32 %v759_v30, %v823_v39  ;;  %v919_v46 = vmax.f32 %v791_v31, %v855_v41 }
 0x126   :  { %948 = vst [vmem:[%s1691_s4 + $0xe0] sm:$0xff] %v884_v42  ;;  %980 = vst [vmem:[%s1691_s4 + $0x1e0] sm:$0xff] %v916_v43  ;;  %v885_v40 = vmax.f32 %v757_v34, %v821_v44  ;;  %v917_v47 = vmax.f32 %v789_v35, %v853_v38 }
 0x127   :  { %951 = vst [vmem:[%s1691_s4 + $0xf8] sm:$0xff] %v887_v45  ;;  %983 = vst [vmem:[%s1691_s4 + $0x1f8] sm:$0xff] %v919_v46 }
 0x128   :  { %949 = vst [vmem:[%s1691_s4 + $0xe8] sm:$0xff] %v885_v40  ;;  %981 = vst [vmem:[%s1691_s4 + $0x1e8] sm:$0xff] %v917_v47 }

</bundles_post_ra>
